<compile_context>
chip_gen: v6e
topology: v6e:2x2x1
jax: 0.10.0
libtpu: 0.0.40
codegen_flags: <defaults>
</compile_context>

<pallas_src>
import functools
import math

import jax
import jax.numpy as jnp
from jax.experimental import pallas as pl
from jax.experimental.pallas import tpu as pltpu

_HI = jax.lax.Precision.HIGHEST

VMEM_PARAMS = ["basis", "selT", "wmax", "wdct", "ln1g", "ln1b",
               "w1", "b1", "ln2g", "ln2b", "w2", "b2"]
SMEM_PARAMS = ["lcw", "lcb"]


def _channelatt_kernel(x_ref, basis_ref, selT_ref, wmax_ref, wdct_ref,
                       ln1g_ref, ln1b_ref, w1_ref, b1_ref,
                       ln2g_ref, ln2b_ref, w2_ref, b2_ref,
                       lcw_ref, lcb_ref, out_ref, *, hw_valid):
    bt, C, HWp = x_ref.shape
    nf = basis_ref.shape[0]

    x = x_ref[...]                                               # (bt, C, HWp), input dtype

    # --- adaptive max pool over spatial (mask padded lanes if HW was padded) ------
    if hw_valid != HWp:
        lane_hw = jax.lax.broadcasted_iota(jnp.int32, (1, 1, HWp), 2)
        neg = jnp.asarray(jnp.finfo(x.dtype).min, x.dtype)
        x_for_max = jnp.where(lane_hw < hw_valid, x, neg)
    else:
        x_for_max = x
    maxp = jnp.max(x_for_max, axis=2).astype(jnp.float32)        # (bt, C)

    # --- multi-spectral DCT pooling: one batched MXU contraction over HW ----------
    # bf16 operands, f32 accumulation (basis is stored in bf16; padded lanes are 0).
    xb = x.astype(jnp.bfloat16)
    basis_b = jnp.broadcast_to(basis_ref[...][None], (bt, nf, HWp))      # (bt, nf, HWp)
    dct = jnp.einsum("bch,bfh->bcf", xb, basis_b,
                     preferred_element_type=jnp.float32)          # (bt, C, nf)
    dctp = jnp.sum(dct * selT_ref[...][None, :, :], axis=-1)      # (bt, C)

    x_sc = wmax_ref[...] * maxp + wdct_ref[...] * dctp            # (bt, C)

    # --- Conv1d(1, 1, k=3, pad=1) over channels: XLU rotates + boundary masks -----
    lane_c = jax.lax.broadcasted_iota(jnp.int32, (1, C), 1)
    c0 = lcw_ref[0]
    c1 = lcw_ref[1]
    c2 = lcw_ref[2]
    left = jnp.where(lane_c > 0, pltpu.roll(x_sc, 1, axis=1), 0.0)           # x_sc[c-1]
    right = jnp.where(lane_c < C - 1, pltpu.roll(x_sc, C - 1, axis=1), 0.0)  # x_sc[c+1]
    x_lc = c0 * left + c1 * x_sc + c2 * right + lcb_ref[0]        # (bt, C)

    # --- LayerNorm([C, 1]) over (x_sc + x_lc), per sample --------------------------
    y = x_sc + x_lc
    mu = jnp.mean(y, axis=1, keepdims=True)
    var = jnp.mean((y - mu) ** 2, axis=1, keepdims=True)
    att = (y - mu) * jax.lax.rsqrt(var + 1e-5) * ln1g_ref[...] + ln1b_ref[...]

    # --- gct: 1x1 conv -> LayerNorm([mid,1,1]) -> ReLU -> 1x1 conv -----------------
    z = jnp.dot(att, w1_ref[...], preferred_element_type=jnp.float32,
                precision=_HI) + b1_ref[...]                      # (bt, mid)
    mu2 = jnp.mean(z, axis=1, keepdims=True)
    var2 = jnp.mean((z - mu2) ** 2, axis=1, keepdims=True)
    z = (z - mu2) * jax.lax.rsqrt(var2 + 1e-5) * ln2g_ref[...] + ln2b_ref[...]
    z = jnp.maximum(z, 0.0)
    att_g = jnp.dot(z, w2_ref[...], preferred_element_type=jnp.float32,
                    precision=_HI) + b2_ref[...]                  # (bt, C)

    # --- residual broadcast add over the spatial (lane) axis -----------------------
    out_ref[...] = (x + att_g.astype(x.dtype)[:, :, None]).astype(out_ref.dtype)


def _round_up(v, m):
    return ((v + m - 1) // m) * m


def _vmem_capacity_bytes():
    try:
        return int(pltpu.get_tpu_info().vmem_capacity_bytes)
    except Exception:
        return 64 * 1024 * 1024          # conservative (v7x-sized) fallback


def _pick_tiling(N, C, HW_pad, itemsize):
    """Batch tile + vmem limit: big blocks, v7x-safe caps, >=2 grid steps."""
    cap = _vmem_capacity_bytes()
    per_block = max(1 << 20, min(12 << 20, cap // 8))   # ~12 MiB @128 MiB, ~8 MiB @64 MiB
    per_sample = max(1, C * HW_pad * itemsize)
    bt = max(1, min(N, per_block // per_sample))
    if N >= 2:
        bt = min(bt, (N + 1) // 2)       # keep >= 2 grid steps (v7x 2-TC sharding)
    blocks = 4 * bt * per_sample          # double-buffered input + output blocks
    vmem_limit = blocks + max(16 << 20, blocks // 2)    # in-kernel temps + params headroom
    vmem_limit = int(min(max(vmem_limit, 32 << 20), cap * 3 // 4))
    return bt, vmem_limit


def _channelatt_forward_impl(x, params):
    N, C, H, W = x.shape
    HW = H * W
    HWp = _round_up(HW, 128)             # lane-dense stores
    dtype = x.dtype

    bt, vmem_limit = _pick_tiling(N, C, HWp, jnp.dtype(dtype).itemsize)
    n_pad = _round_up(N, bt)

    x2 = x.reshape(N, C, HW)
    if HWp != HW or n_pad != N:
        x2 = jnp.pad(x2, ((0, n_pad - N), (0, 0), (0, HWp - HW)))

    basis = params["basis"].astype(jnp.bfloat16)                  # (nf, HW)
    if HWp != HW:
        basis = jnp.pad(basis, ((0, 0), (0, HWp - HW)))           # zero over padded lanes
    vmem_args = [basis] + [params[k].astype(jnp.float32) for k in VMEM_PARAMS[1:]]
    smem_args = [params[k].astype(jnp.float32) for k in SMEM_PARAMS]

    def full_vmem_spec(a):
        nd = a.ndim
        return pl.BlockSpec(a.shape, lambda n, _nd=nd: (0,) * _nd)

    smem_spec = pl.BlockSpec(memory_space=pltpu.MemorySpace.SMEM)

    kernel = functools.partial(_channelatt_kernel, hw_valid=HW)

    out = pl.pallas_call(
        kernel,
        out_shape=jax.ShapeDtypeStruct((n_pad, C, HWp), dtype),
        grid=(n_pad // bt,),
        in_specs=([pl.BlockSpec((bt, C, HWp), lambda n: (n, 0, 0))]
                  + [full_vmem_spec(a) for a in vmem_args]
                  + [smem_spec] * len(smem_args)),
        out_specs=pl.BlockSpec((bt, C, HWp), lambda n: (n, 0, 0)),
        compiler_params=pltpu.CompilerParams(
            dimension_semantics=("parallel",),
            vmem_limit_bytes=vmem_limit),
    )(x2, *vmem_args, *smem_args)

    return out[:N, :, :HW].reshape(N, C, H, W)


channelatt_forward = jax.jit(_channelatt_forward_impl)


def make_dct_basis(H, W, num_freq=2):
    """FcaNet-style 2D DCT filters, one row per frequency, flattened to (F, H*W)."""
    freqs = [(0, 0), (0, 1)][:num_freq]
    i = jnp.arange(H, dtype=jnp.float32)[:, None]
    j = jnp.arange(W, dtype=jnp.float32)[None, :]
    rows = []
    for (u, v) in freqs:
        fx = jnp.cos(jnp.pi * (i + 0.5) * u / H)
        fy = jnp.cos(jnp.pi * (j + 0.5) * v / W)
        rows.append((fx * fy).reshape(1, H * W))
    return jnp.concatenate(rows, axis=0).astype(jnp.float32)         # (F, HW)


def make_freq_selector(C, num_freq=2):
    """(C, F) one-hot: channel c uses frequency floor(c / (C // F)) (clamped)."""
    per = max(1, C // num_freq)
    ch_freq = jnp.minimum(jnp.arange(C) // per, num_freq - 1)
    return jax.nn.one_hot(ch_freq, num_freq, dtype=jnp.float32)       # (C, F)


def make_params(C, reduction, H, W, key):
    mid = max(1, int(C * (1.0 / reduction)))
    ks = jax.random.split(key, 10)
    return {
        "basis": make_dct_basis(H, W, 2).astype(jnp.bfloat16),        # (F, HW) bf16 (MXU-native)
        "selT": make_freq_selector(C, 2),                             # (C, F)
        "wmax": jnp.full((1, C), 0.5, jnp.float32),
        "wdct": jnp.full((1, C), 0.5, jnp.float32),
        "lcw": jax.random.normal(ks[0], (3,), jnp.float32) * 0.5,     # Conv1d(1,1,3) taps
        "lcb": 0.1 * jax.random.normal(ks[1], (1,), jnp.float32),
        "ln1g": 1.0 + 0.1 * jax.random.normal(ks[2], (1, C), jnp.float32),
        "ln1b": 0.1 * jax.random.normal(ks[3], (1, C), jnp.float32),
        "w1": jax.random.normal(ks[4], (C, mid), jnp.float32) / math.sqrt(C),
        "b1": 0.1 * jax.random.normal(ks[5], (1, mid), jnp.float32),
        "ln2g": 1.0 + 0.1 * jax.random.normal(ks[6], (1, mid), jnp.float32),
        "ln2b": 0.1 * jax.random.normal(ks[7], (1, mid), jnp.float32),
        "w2": jax.random.normal(ks[8], (mid, C), jnp.float32) / math.sqrt(mid),
        "b2": 0.1 * jax.random.normal(ks[9], (1, C), jnp.float32),
    }


def reference_forward(x, p):
    """Pure-JAX reference mirroring the PyTorch forward (NCHW)."""
    N, C, H, W = x.shape
    HW = H * W
    xr = x.reshape(N, C, HW).astype(jnp.float32)
    basis = p["basis"].astype(jnp.float32)                            # bf16-valued, (F, HW)
    selT = p["selT"].astype(jnp.float32)                              # (C, F)

    maxp = jnp.max(xr, axis=-1)                                       # (N, C)
    # DCT pooling: the kernel feeds the MXU with bf16 operands (f32 accumulation);
    # mirror that operand truncation here so the check stays tight.
    xb = xr.astype(jnp.bfloat16).astype(jnp.float32)
    dct = jnp.einsum("bch,fh->bcf", xb, basis, precision=_HI)         # (N, C, F)
    dctp = jnp.sum(dct * selT[None, :, :], axis=-1)                   # (N, C)
    x_sc = p["wmax"] * maxp + p["wdct"] * dctp                        # (N, C)

    c0, c1, c2 = p["lcw"][0], p["lcw"][1], p["lcw"][2]
    left = jnp.pad(x_sc, ((0, 0), (1, 0)))[:, :C]                     # x_sc[c-1], 0 at c=0
    right = jnp.pad(x_sc, ((0, 0), (0, 1)))[:, 1:]                    # x_sc[c+1], 0 at c=C-1
    x_lc = c0 * left + c1 * x_sc + c2 * right + p["lcb"][0]

    y = x_sc + x_lc
    mu = jnp.mean(y, axis=1, keepdims=True)
    var = jnp.mean((y - mu) ** 2, axis=1, keepdims=True)
    att = (y - mu) / jnp.sqrt(var + 1e-5) * p["ln1g"] + p["ln1b"]

    z = jnp.dot(att, p["w1"], precision=_HI) + p["b1"]                # (N, mid)
    mu2 = jnp.mean(z, axis=1, keepdims=True)
    var2 = jnp.mean((z - mu2) ** 2, axis=1, keepdims=True)
    z = (z - mu2) / jnp.sqrt(var2 + 1e-5) * p["ln2g"] + p["ln2b"]
    z = jnp.maximum(z, 0.0)
    att_g = jnp.dot(z, p["w2"], precision=_HI) + p["b2"]              # (N, C)
    return x + att_g[:, :, None, None]


if __name__ == "__main__":
    key = jax.random.PRNGKey(0)
    cases = [
        (2, 32, 16, 16, 4),   # HW=256: already lane-aligned, no padding path
        (3, 16, 12, 12, 4),   # HW=144 -> padded to 256; N padded to a multiple of bt
    ]
    for idx, (N, C, H, W, reduction) in enumerate(cases):
        kx, kp, key = jax.random.split(key, 3)
        x = jax.random.normal(kx, (N, C, H, W), jnp.float32)
        params = make_params(C, reduction, H, W, kp)

        out = jax.block_until_ready(channelatt_forward(x, params))
        ref = reference_forward(x, params)

        assert out.shape == (N, C, H, W)
        max_err = float(jnp.max(jnp.abs(out - ref)))
        assert jnp.allclose(out, ref, rtol=2e-3, atol=2e-3), (
            f"case {idx}: mismatch vs JAX reference (max abs err {max_err:.3e})")
    print("KERNEL_OK")
</pallas_src>

<mosaic_0001>
module attributes {stable_mosaic.version = 11 : i64} {
  func.func @_channelatt_kernel(%arg0: i32, %arg1: memref<1x32x256xf32, #tpu.memory_space<vmem>>, %arg2: memref<2x256xbf16, #tpu.memory_space<vmem>>, %arg3: memref<32x2xf32, #tpu.memory_space<vmem>>, %arg4: memref<1x32xf32, #tpu.memory_space<vmem>>, %arg5: memref<1x32xf32, #tpu.memory_space<vmem>>, %arg6: memref<1x32xf32, #tpu.memory_space<vmem>>, %arg7: memref<1x32xf32, #tpu.memory_space<vmem>>, %arg8: memref<32x8xf32, #tpu.memory_space<vmem>>, %arg9: memref<1x8xf32, #tpu.memory_space<vmem>>, %arg10: memref<1x8xf32, #tpu.memory_space<vmem>>, %arg11: memref<1x8xf32, #tpu.memory_space<vmem>>, %arg12: memref<8x32xf32, #tpu.memory_space<vmem>>, %arg13: memref<1x32xf32, #tpu.memory_space<vmem>>, %arg14: memref<3xf32, #tpu.memory_space<smem>>, %arg15: memref<1xf32, #tpu.memory_space<smem>>, %arg16: memref<1x32x256xf32, #tpu.memory_space<vmem>>) attributes {dimension_semantics = [#tpu.dimension_semantics<parallel>], iteration_bounds = array<i64: 2>, scalar_prefetch = 0 : i64, scratch_operands = 0 : i64, tpu.core_type = #tpu.core_type<tc>, window_params = [{transform_indices = @transform_0, window_bounds = array<i64: 1, 32, 256>}, {pipeline_mode = #tpu.pipeline_mode<synchronous>, transform_indices = @transform_1, window_bounds = array<i64: 2, 256>}, {pipeline_mode = #tpu.pipeline_mode<synchronous>, transform_indices = @transform_2, window_bounds = array<i64: 32, 2>}, {pipeline_mode = #tpu.pipeline_mode<synchronous>, transform_indices = @transform_3, window_bounds = array<i64: 1, 32>}, {pipeline_mode = #tpu.pipeline_mode<synchronous>, transform_indices = @transform_4, window_bounds = array<i64: 1, 32>}, {pipeline_mode = #tpu.pipeline_mode<synchronous>, transform_indices = @transform_5, window_bounds = array<i64: 1, 32>}, {pipeline_mode = #tpu.pipeline_mode<synchronous>, transform_indices = @transform_6, window_bounds = array<i64: 1, 32>}, {pipeline_mode = #tpu.pipeline_mode<synchronous>, transform_indices = @transform_7, window_bounds = array<i64: 32, 8>}, {pipeline_mode = #tpu.pipeline_mode<synchronous>, transform_indices = @transform_8, window_bounds = array<i64: 1, 8>}, {pipeline_mode = #tpu.pipeline_mode<synchronous>, transform_indices = @transform_9, window_bounds = array<i64: 1, 8>}, {pipeline_mode = #tpu.pipeline_mode<synchronous>, transform_indices = @transform_10, window_bounds = array<i64: 1, 8>}, {pipeline_mode = #tpu.pipeline_mode<synchronous>, transform_indices = @transform_11, window_bounds = array<i64: 8, 32>}, {pipeline_mode = #tpu.pipeline_mode<synchronous>, transform_indices = @transform_12, window_bounds = array<i64: 1, 32>}, {transform_indices = @transform_13, window_bounds = array<i64: 3>}, {transform_indices = @transform_14, window_bounds = array<i64: 1>}, {transform_indices = @transform_15, window_bounds = array<i64: 1, 32, 256>}]} {
    %c0 = arith.constant 0 : index
    %c0_0 = arith.constant 0 : index
    %c0_1 = arith.constant 0 : index
    %0 = vector.load %arg1[%c0, %c0_0, %c0_1] : memref<1x32x256xf32, #tpu.memory_space<vmem>>, vector<1x32x256xf32>
    %cst = arith.constant dense<0xFF800000> : vector<1x32xf32>
    %1 = vector.multi_reduction <maximumf>, %0, %cst [2] : vector<1x32x256xf32> to vector<1x32xf32>
    %2 = arith.truncf %0 : vector<1x32x256xf32> to vector<1x32x256xbf16>
    %c0_2 = arith.constant 0 : index
    %c0_3 = arith.constant 0 : index
    %3 = vector.load %arg2[%c0_2, %c0_3] : memref<2x256xbf16, #tpu.memory_space<vmem>>, vector<2x256xbf16>
    %4 = vector.shape_cast %3 : vector<2x256xbf16> to vector<1x2x256xbf16>
    "tpu.trace_start"() <{level = 10 : i32, message = "bch,bfh->bcf"}> : () -> ()
    %cst_4 = arith.constant dense<0.000000e+00> : vector<1x32x2xf32>
    %5 = tpu.matmul %2, %4, %cst_4 {dimension_numbers = #tpu.dot_dimension_numbers<[2], [2], [1], [1], [0, 0, 0, 1, 1, 1], [0], [0]>} : vector<1x32x256xbf16>, vector<1x2x256xbf16>, vector<1x32x2xf32> -> vector<1x32x2xf32>
    "tpu.trace_stop"() : () -> ()
    %c0_5 = arith.constant 0 : index
    %c0_6 = arith.constant 0 : index
    %6 = vector.load %arg3[%c0_5, %c0_6] : memref<32x2xf32, #tpu.memory_space<vmem>>, vector<32x2xf32>
    %7 = vector.shape_cast %6 : vector<32x2xf32> to vector<1x32x2xf32>
    %8 = arith.mulf %5, %7 : vector<1x32x2xf32>
    %cst_7 = arith.constant dense<0.000000e+00> : vector<1x32xf32>
    %9 = vector.multi_reduction <add>, %8, %cst_7 [2] : vector<1x32x2xf32> to vector<1x32xf32>
    %c0_8 = arith.constant 0 : index
    %c0_9 = arith.constant 0 : index
    %10 = vector.load %arg4[%c0_8, %c0_9] : memref<1x32xf32, #tpu.memory_space<vmem>>, vector<1x32xf32>
    %11 = arith.mulf %10, %1 : vector<1x32xf32>
    %c0_10 = arith.constant 0 : index
    %c0_11 = arith.constant 0 : index
    %12 = vector.load %arg5[%c0_10, %c0_11] : memref<1x32xf32, #tpu.memory_space<vmem>>, vector<1x32xf32>
    %13 = arith.mulf %12, %9 : vector<1x32xf32>
    %14 = arith.addf %11, %13 : vector<1x32xf32>
    %15 = tpu.iota {dimensions = array<i32: 1>} : vector<1x32xi32>
    %c0_12 = arith.constant 0 : index
    %16 = memref.load %arg14[%c0_12] : memref<3xf32, #tpu.memory_space<smem>>
    %c1 = arith.constant 1 : index
    %17 = memref.load %arg14[%c1] : memref<3xf32, #tpu.memory_space<smem>>
    %c2 = arith.constant 2 : index
    %18 = memref.load %arg14[%c2] : memref<3xf32, #tpu.memory_space<smem>>
    %c0_i32 = arith.constant 0 : i32
    %19 = vector.broadcast %c0_i32 : i32 to vector<1x32xi32>
    %20 = arith.cmpi sgt, %15, %19 : vector<1x32xi32>
    %c1_i32 = arith.constant 1 : i32
    %21 = tpu.dynamic_rotate %14 by %c1_i32 dim 1 : vector<1x32xf32>, i32 -> vector<1x32xf32>
    %cst_13 = arith.constant 0.000000e+00 : f32
    %22 = vector.broadcast %cst_13 : f32 to vector<1x32xf32>
    %23 = arith.select %20, %21, %22 : vector<1x32xi1>, vector<1x32xf32>
    %c31_i32 = arith.constant 31 : i32
    %24 = vector.broadcast %c31_i32 : i32 to vector<1x32xi32>
    %25 = arith.cmpi slt, %15, %24 : vector<1x32xi32>
    %c31_i32_14 = arith.constant 31 : i32
    %26 = tpu.dynamic_rotate %14 by %c31_i32_14 dim 1 : vector<1x32xf32>, i32 -> vector<1x32xf32>
    %cst_15 = arith.constant 0.000000e+00 : f32
    %27 = vector.broadcast %cst_15 : f32 to vector<1x32xf32>
    %28 = arith.select %25, %26, %27 : vector<1x32xi1>, vector<1x32xf32>
    %29 = vector.broadcast %16 : f32 to vector<1x32xf32>
    %30 = arith.mulf %29, %23 : vector<1x32xf32>
    %31 = vector.broadcast %17 : f32 to vector<1x32xf32>
    %32 = arith.mulf %31, %14 : vector<1x32xf32>
    %33 = arith.addf %30, %32 : vector<1x32xf32>
    %34 = vector.broadcast %18 : f32 to vector<1x32xf32>
    %35 = arith.mulf %34, %28 : vector<1x32xf32>
    %36 = arith.addf %33, %35 : vector<1x32xf32>
    %c0_16 = arith.constant 0 : index
    %37 = memref.load %arg15[%c0_16] : memref<1xf32, #tpu.memory_space<smem>>
    %38 = vector.broadcast %37 : f32 to vector<1x32xf32>
    %39 = arith.addf %36, %38 : vector<1x32xf32>
    %40 = arith.addf %14, %39 : vector<1x32xf32>
    %cst_17 = arith.constant dense<0.000000e+00> : vector<1xf32>
    %41 = vector.multi_reduction <add>, %40, %cst_17 [1] : vector<1x32xf32> to vector<1xf32>
    %42 = vector.shape_cast %41 : vector<1xf32> to vector<1x1xf32>
    %cst_18 = arith.constant 3.200000e+01 : f32
    %43 = vector.broadcast %cst_18 : f32 to vector<1x1xf32>
    %44 = arith.divf %42, %43 : vector<1x1xf32>
    %45 = vector.broadcast %44 : vector<1x1xf32> to vector<1x32xf32>
    %46 = arith.subf %40, %45 : vector<1x32xf32>
    %47 = arith.mulf %46, %46 : vector<1x32xf32>
    %cst_19 = arith.constant dense<0.000000e+00> : vector<1xf32>
    %48 = vector.multi_reduction <add>, %47, %cst_19 [1] : vector<1x32xf32> to vector<1xf32>
    %49 = vector.shape_cast %48 : vector<1xf32> to vector<1x1xf32>
    %cst_20 = arith.constant 3.200000e+01 : f32
    %50 = vector.broadcast %cst_20 : f32 to vector<1x1xf32>
    %51 = arith.divf %49, %50 : vector<1x1xf32>
    %52 = vector.broadcast %44 : vector<1x1xf32> to vector<1x32xf32>
    %53 = arith.subf %40, %52 : vector<1x32xf32>
    %cst_21 = arith.constant 9.99999974E-6 : f32
    %54 = vector.broadcast %cst_21 : f32 to vector<1x1xf32>
    %55 = arith.addf %51, %54 : vector<1x1xf32>
    %56 = math.rsqrt %55 : vector<1x1xf32>
    %57 = vector.broadcast %56 : vector<1x1xf32> to vector<1x32xf32>
    %58 = arith.mulf %53, %57 : vector<1x32xf32>
    %c0_22 = arith.constant 0 : index
    %c0_23 = arith.constant 0 : index
    %59 = vector.load %arg6[%c0_22, %c0_23] : memref<1x32xf32, #tpu.memory_space<vmem>>, vector<1x32xf32>
    %60 = arith.mulf %58, %59 : vector<1x32xf32>
    %c0_24 = arith.constant 0 : index
    %c0_25 = arith.constant 0 : index
    %61 = vector.load %arg7[%c0_24, %c0_25] : memref<1x32xf32, #tpu.memory_space<vmem>>, vector<1x32xf32>
    %62 = arith.addf %60, %61 : vector<1x32xf32>
    %c0_26 = arith.constant 0 : index
    %c0_27 = arith.constant 0 : index
    %63 = vector.load %arg8[%c0_26, %c0_27] : memref<32x8xf32, #tpu.memory_space<vmem>>, vector<32x8xf32>
    %cst_28 = arith.constant dense<0.000000e+00> : vector<1x8xf32>
    %64 = tpu.matmul %62, %63, %cst_28 {dimension_numbers = #tpu.dot_dimension_numbers<[1], [0], [0], [1], [0, 0, 1, 1], [], []>, precision = #tpu.contract_precision<fp32>} : vector<1x32xf32>, vector<32x8xf32>, vector<1x8xf32> -> vector<1x8xf32>
    %c0_29 = arith.constant 0 : index
    %c0_30 = arith.constant 0 : index
    %65 = vector.load %arg9[%c0_29, %c0_30] : memref<1x8xf32, #tpu.memory_space<vmem>>, vector<1x8xf32>
    %66 = arith.addf %64, %65 : vector<1x8xf32>
    %cst_31 = arith.constant dense<0.000000e+00> : vector<1xf32>
    %67 = vector.multi_reduction <add>, %66, %cst_31 [1] : vector<1x8xf32> to vector<1xf32>
    %68 = vector.shape_cast %67 : vector<1xf32> to vector<1x1xf32>
    %cst_32 = arith.constant 8.000000e+00 : f32
    %69 = vector.broadcast %cst_32 : f32 to vector<1x1xf32>
    %70 = arith.divf %68, %69 : vector<1x1xf32>
    %71 = vector.broadcast %70 : vector<1x1xf32> to vector<1x8xf32>
    %72 = arith.subf %66, %71 : vector<1x8xf32>
    %73 = arith.mulf %72, %72 : vector<1x8xf32>
    %cst_33 = arith.constant dense<0.000000e+00> : vector<1xf32>
    %74 = vector.multi_reduction <add>, %73, %cst_33 [1] : vector<1x8xf32> to vector<1xf32>
    %75 = vector.shape_cast %74 : vector<1xf32> to vector<1x1xf32>
    %cst_34 = arith.constant 8.000000e+00 : f32
    %76 = vector.broadcast %cst_34 : f32 to vector<1x1xf32>
    %77 = arith.divf %75, %76 : vector<1x1xf32>
    %78 = vector.broadcast %70 : vector<1x1xf32> to vector<1x8xf32>
    %79 = arith.subf %66, %78 : vector<1x8xf32>
    %cst_35 = arith.constant 9.99999974E-6 : f32
    %80 = vector.broadcast %cst_35 : f32 to vector<1x1xf32>
    %81 = arith.addf %77, %80 : vector<1x1xf32>
    %82 = math.rsqrt %81 : vector<1x1xf32>
    %83 = vector.broadcast %82 : vector<1x1xf32> to vector<1x8xf32>
    %84 = arith.mulf %79, %83 : vector<1x8xf32>
    %c0_36 = arith.constant 0 : index
    %c0_37 = arith.constant 0 : index
    %85 = vector.load %arg10[%c0_36, %c0_37] : memref<1x8xf32, #tpu.memory_space<vmem>>, vector<1x8xf32>
    %86 = arith.mulf %84, %85 : vector<1x8xf32>
    %c0_38 = arith.constant 0 : index
    %c0_39 = arith.constant 0 : index
    %87 = vector.load %arg11[%c0_38, %c0_39] : memref<1x8xf32, #tpu.memory_space<vmem>>, vector<1x8xf32>
    %88 = arith.addf %86, %87 : vector<1x8xf32>
    %cst_40 = arith.constant 0.000000e+00 : f32
    %89 = vector.broadcast %cst_40 : f32 to vector<1x8xf32>
    %90 = arith.maximumf %88, %89 : vector<1x8xf32>
    %c0_41 = arith.constant 0 : index
    %c0_42 = arith.constant 0 : index
    %91 = vector.load %arg12[%c0_41, %c0_42] : memref<8x32xf32, #tpu.memory_space<vmem>>, vector<8x32xf32>
    %cst_43 = arith.constant dense<0.000000e+00> : vector<1x32xf32>
    %92 = tpu.matmul %90, %91, %cst_43 {dimension_numbers = #tpu.dot_dimension_numbers<[1], [0], [0], [1], [0, 0, 1, 1], [], []>, precision = #tpu.contract_precision<fp32>} : vector<1x8xf32>, vector<8x32xf32>, vector<1x32xf32> -> vector<1x32xf32>
    %c0_44 = arith.constant 0 : index
    %c0_45 = arith.constant 0 : index
    %93 = vector.load %arg13[%c0_44, %c0_45] : memref<1x32xf32, #tpu.memory_space<vmem>>, vector<1x32xf32>
    %94 = arith.addf %92, %93 : vector<1x32xf32>
    %95 = vector.shape_cast %94 : vector<1x32xf32> to vector<1x32x1xf32>
    %96 = vector.broadcast %95 : vector<1x32x1xf32> to vector<1x32x256xf32>
    %97 = arith.addf %0, %96 : vector<1x32x256xf32>
    %c0_46 = arith.constant 0 : index
    %c0_47 = arith.constant 0 : index
    %c0_48 = arith.constant 0 : index
    %98 = vector.load %arg16[%c0_46, %c0_47, %c0_48] : memref<1x32x256xf32, #tpu.memory_space<vmem>>, vector<1x32x256xf32>
    tpu.vector_store %arg16[%c0_46, %c0_47, %c0_48], %97 {strides = array<i32>} : memref<1x32x256xf32, #tpu.memory_space<vmem>>, vector<1x32x256xf32>,
    return
  }
  func.func @transform_0(%arg0: i32) -> (i32, i32, i32) {
    %c0_i32 = arith.constant 0 : i32
    %c0_i32_0 = arith.constant 0 : i32
    %c0_i32_1 = arith.constant 0 : i32
    return %arg0, %c0_i32, %c0_i32_0 : i32, i32, i32
  }
  func.func @transform_1(%arg0: i32) -> (i32, i32) {
    %c0_i32 = arith.constant 0 : i32
    %c0_i32_0 = arith.constant 0 : i32
    %c0_i32_1 = arith.constant 0 : i32
    return %c0_i32, %c0_i32_0 : i32, i32
  }
  func.func @transform_2(%arg0: i32) -> (i32, i32) {
    %c0_i32 = arith.constant 0 : i32
    %c0_i32_0 = arith.constant 0 : i32
    %c0_i32_1 = arith.constant 0 : i32
    return %c0_i32, %c0_i32_0 : i32, i32
  }
  func.func @transform_3(%arg0: i32) -> (i32, i32) {
    %c0_i32 = arith.constant 0 : i32
    %c0_i32_0 = arith.constant 0 : i32
    %c0_i32_1 = arith.constant 0 : i32
    return %c0_i32, %c0_i32_0 : i32, i32
  }
  func.func @transform_4(%arg0: i32) -> (i32, i32) {
    %c0_i32 = arith.constant 0 : i32
    %c0_i32_0 = arith.constant 0 : i32
    %c0_i32_1 = arith.constant 0 : i32
    return %c0_i32, %c0_i32_0 : i32, i32
  }
  func.func @transform_5(%arg0: i32) -> (i32, i32) {
    %c0_i32 = arith.constant 0 : i32
    %c0_i32_0 = arith.constant 0 : i32
    %c0_i32_1 = arith.constant 0 : i32
    return %c0_i32, %c0_i32_0 : i32, i32
  }
  func.func @transform_6(%arg0: i32) -> (i32, i32) {
    %c0_i32 = arith.constant 0 : i32
    %c0_i32_0 = arith.constant 0 : i32
    %c0_i32_1 = arith.constant 0 : i32
    return %c0_i32, %c0_i32_0 : i32, i32
  }
  func.func @transform_7(%arg0: i32) -> (i32, i32) {
    %c0_i32 = arith.constant 0 : i32
    %c0_i32_0 = arith.constant 0 : i32
    %c0_i32_1 = arith.constant 0 : i32
    return %c0_i32, %c0_i32_0 : i32, i32
  }
  func.func @transform_8(%arg0: i32) -> (i32, i32) {
    %c0_i32 = arith.constant 0 : i32
    %c0_i32_0 = arith.constant 0 : i32
    %c0_i32_1 = arith.constant 0 : i32
    return %c0_i32, %c0_i32_0 : i32, i32
  }
  func.func @transform_9(%arg0: i32) -> (i32, i32) {
    %c0_i32 = arith.constant 0 : i32
    %c0_i32_0 = arith.constant 0 : i32
    %c0_i32_1 = arith.constant 0 : i32
    return %c0_i32, %c0_i32_0 : i32, i32
  }
  func.func @transform_10(%arg0: i32) -> (i32, i32) {
    %c0_i32 = arith.constant 0 : i32
    %c0_i32_0 = arith.constant 0 : i32
    %c0_i32_1 = arith.constant 0 : i32
    return %c0_i32, %c0_i32_0 : i32, i32
  }
  func.func @transform_11(%arg0: i32) -> (i32, i32) {
    %c0_i32 = arith.constant 0 : i32
    %c0_i32_0 = arith.constant 0 : i32
    %c0_i32_1 = arith.constant 0 : i32
    return %c0_i32, %c0_i32_0 : i32, i32
  }
  func.func @transform_12(%arg0: i32) -> (i32, i32) {
    %c0_i32 = arith.constant 0 : i32
    %c0_i32_0 = arith.constant 0 : i32
    %c0_i32_1 = arith.constant 0 : i32
    return %c0_i32, %c0_i32_0 : i32, i32
  }
  func.func @transform_13(%arg0: i32) -> i32 {
    %c0_i32 = arith.constant 0 : i32
    %c0_i32_0 = arith.constant 0 : i32
    return %c0_i32 : i32
  }
  func.func @transform_14(%arg0: i32) -> i32 {
    %c0_i32 = arith.constant 0 : i32
    %c0_i32_0 = arith.constant 0 : i32
    return %c0_i32 : i32
  }
  func.func @transform_15(%arg0: i32) -> (i32, i32, i32) {
    %c0_i32 = arith.constant 0 : i32
    %c0_i32_0 = arith.constant 0 : i32
    %c0_i32_1 = arith.constant 0 : i32
    return %arg0, %c0_i32, %c0_i32_0 : i32, i32, i32
  }
}

</mosaic_0001>

<bundles_post_ra>
// kernel: _channelatt_forward_impl.1
= control target key start
LH: loop header
LB: loop body
LE: loop exit
PB: predicated region body
PF: predicated region fallthrough
CT: control target
= control target key end

     0   :  { %s3190_s0 = inlined_call_operand.vmem [shape: f32[2,32,256], index: 0, kind: input, shape index: {}]   ;;  %s3191_s1 = inlined_call_operand.vmem [shape: bf16[2,256], index: 1, kind: input, shape index: {}]   ;;  %s3192_s2 = inlined_call_operand.vmem [shape: f32[32,2], index: 2, kind: input, shape index: {}]   ;;  %s3193_s3 = inlined_call_operand.vmem [shape: f32[1,32], index: 3, kind: input, shape index: {}]   ;;  %s3194_s4 = inlined_call_operand.vmem [shape: f32[1,32], index: 4, kind: input, shape index: {}]   ;;  %s3195_s5 = inlined_call_operand.vmem [shape: f32[1,32], index: 5, kind: input, shape index: {}]   ;;  %s3196_s6 = inlined_call_operand.vmem [shape: f32[1,32], index: 6, kind: input, shape index: {}]   ;;  %s3197_s7 = inlined_call_operand.vmem [shape: f32[32,8], index: 7, kind: input, shape index: {}]   ;;  %s3198_s8 = inlined_call_operand.vmem [shape: f32[1,8], index: 8, kind: input, shape index: {}]   ;;  %s3199_s9 = inlined_call_operand.vmem [shape: f32[1,8], index: 9, kind: input, shape index: {}]   ;;  %s3200_s10 = inlined_call_operand.vmem [shape: f32[1,8], index: 10, kind: input, shape index: {}]   ;;  %s3201_s11 = inlined_call_operand.vmem [shape: f32[8,32], index: 11, kind: input, shape index: {}]   ;;  %s3202_s12 = inlined_call_operand.vmem [shape: f32[1,32], index: 12, kind: input, shape index: {}]   ;;  %s3203_s13 = inlined_call_operand.vmem [shape: f32[3], index: 13, kind: input, shape index: {}]   ;;  %s3204_s14 = inlined_call_operand.<no memory space> [shape: f32[1], index: 14, kind: input, shape index: {}]   ;;  %s3205_s15 = inlined_call_operand.vmem [shape: f32[2,32,256], index: 15, kind: output, shape index: {}]  }
   0x1   :  { %20 = sst [smem:[#allocation2]] %s3204_s14 }
   0x2   :  { %21 = vsyncpa [#allocation4], 0  ;;  %s2826_s20 = smov 0  }
   0x3 LB: > { %s2832_s21 = sadd.s32 4294967295, %s2733_s20   ;;  %p2514_p0 = scmp.ge.s32.totalorder %s2733_s20, 1  ;;  %s2733_s20 = sphi %s2826_s20, %s27_s20  }
   0x4   : > { %p378_p1 = scmp.lt.s32.totalorder %s2733_s20, 3  ;;  %s427_s14 = sshll.u32 %s3203_s13, 4  ;;  %s428_s14 = int_to_ptr.vmem [resolvable:$true] %s427_s14 }
   0x5   : > { %p2676_p3 = scmp.eq.s32.totalorder %s2832_s21, 0  ;;  %s2708_s25 = scalar_lea.vmem %s428_s14, 16 }
   0x6   : > { %p2839_p2 = pnand %p2514_p0, %p378_p1  ;;  %p2709_p6 = scmp.ne.s32.totalorder %s428_s14, %s2708_s25 }
   0x7   : > { %p2716_p10 = scmp.lt.s32.totalorder %s428_s14, %s428_s14  ;;  %p2717_p11 = scmp.lt.s32.totalorder %s2708_s25, %s2708_s25 }
   0x8   : > { %p2672_p4 = pneg %p2839_p2 }
   0x9   : > { %p2718_p12 = por %p2717_p11, %p2716_p10 }
   0xa   : > { %p2673_p5 = pnand %p2676_p3, %p2672_p4 }
   0xc   : > { %p2710_p7 = pneg %p2673_p5 }
   0xe   : > { %p2711_p8 = pnand %p2710_p7, %p2709_p6 }
  0x10   : > { %p2712_p9 = pneg %p2711_p8 }
  0x12   : > { %p2719_p13 = pnand %p2718_p12, %p2712_p9 }
  0x14   : > { %2722 = shalt.err (!%p2719_p13)
}
  0x15   : > { %s2735_s26 = smov [#allocation3]   ;;  %451 = sbr.rel (%p2839_p2) target bundleno = 2091 (0x82b), region = 80 }
  0x16   : > { %2675 = dma.vmem_to_smem (!%p2673_p5), %s428_s14, 16, %s2735_s26, [#allocation4]  }
  0x1a   : > { %2728 = dma.done.wait (%p2676_p3), [#allocation4], 16  }
  0x1b   : > { %2730 = vsyncadd (%p2676_p3), [#allocation4], 4294967280 }
  0x1c   : > { %457 = sfence }
  0x1d   : > { %v2523_v0 = vld.sshfl [vmem:[%s3191_s1] sm:$0x11 pattern:$0x75316420]  ;;  %v548_v1 = vlaneseq  ;;  %v2736_v2 = vmov 1966171168  }
  0x1e   : > { %v546_v3 = vunpack.c.l.s4 %v2736_v2  ;;  %p500_p0 = scmp.lt.s32.totalorder %s2832_s21, 1  ;;  %v544_v5 = vcombine.high %v2523_v0, %v2523_v0  ;;  %v2737_v26 = vmov 0   ;;  %v610_v57 = vld [vmem:[%s3192_s2] sm:$0xff]  ;;  %vm618_vm0 = vcmask 15360   ;;  %v611_v62 = vld [vmem:[%s3192_s2 + $0x8] sm:$0xff]  ;;  %s2738_s18 = smov 32  }
  0x1f   : > { %v2859_v4 = vshrl.u32 %v548_v1, 7  ;;  %2695 = vset.pattern.permute.xlu1 %v2737_v26  ;;  %2694 = vset.pattern.permute.xlu0 %v2737_v26  ;;  %vm983_vm1 = vcmask 130112   ;;  %vm990_vm2 = vcmask 195712   ;;  %vm997_vm3 = vcmask 261312   ;;  %s2739_s19 = smov 127   ;;  %s2740_s22 = smov 97  }
  0x20   : > { %v547_v6 = vunpack.c.0.s8 %v546_v3  ;;  %s3208_s21 = smov (!%p500_p0, %s2832_s21), 1  ;;  %vm1396_vm4 = vcmask 1047808   ;;  %s2524_s23 = sld [smem:[#allocation3 + $0x1]]  ;;  %vm1425_vm7 = vcmask 253952   ;;  %vm2742_vm8 = vmmov 0  }
  0x21   : > { %s2528_s29 = sshll.u32 %s3208_s21, 6  ;;  %v2886_v27 = vsub.s32 0, %v2859_v4  ;;  %v2889_v28 = vsub.s32 1, %v2859_v4  ;;  %v2892_v29 = vsub.s32 2, %v2859_v4  ;;  %v2895_v30 = vsub.s32 3, %v2859_v4  ;;  %s1392_s14 = sld [smem:[#allocation3]] }
  0x22   : > { %v2865_v7 = vsub.s32 %v547_v6, %v2859_v4  ;;  %s2873_s17 = scalar_lea.vmem %s3190_s0, %s2528_s29  ;;  %v2898_v32 = vsub.s32 4, %v2859_v4  ;;  %v2901_v33 = vsub.s32 5, %v2859_v4  ;;  %v2904_v34 = vsub.s32 6, %v2859_v4  ;;  %s2525_s24 = sld [smem:[#allocation3 + $0x2]] }
  0x23   : > { %v512_v10 = vld [vmem:[%s2873_s17 + $0x8] sm:$0xff]  ;;  %v514_v11 = vld [vmem:[%s2873_s17 + $0x18] sm:$0xff]  ;;  %v511_v12 = vld [vmem:[%s2873_s17] sm:$0xff]  ;;  %v2907_v35 = vsub.s32 7, %v2859_v4  ;;  %s1421_s25 = sld [smem:[#allocation2]]  ;;  %vm1449_vm9 = vcmask 261120   ;;  %s509_s26 = scalar_lea.vmem %s3205_s15, %s2528_s29 }
  0x24   : > { %v558_v8 = vrot.slane %v544_v5, %v2865_v7  ;;  %v551_v9 = vrot.slane %v2523_v0, %v2865_v7  ;;  %v532_v13 = vpack.c.bf16 %v514_v11, %v512_v10  ;;  %v519_v14 = vmax.f32 %v511_v12, %v512_v10  ;;  %v513_v15 = vld [vmem:[%s2873_s17 + $0x10] sm:$0xff]  ;;  %v516_v16 = vld [vmem:[%s2873_s17 + $0x28] sm:$0xff]  ;;  %v518_v17 = vld [vmem:[%s2873_s17 + $0x38] sm:$0xff] }
  0x25   : > { %v522_v18 = vmax.f32 %v513_v15, %v514_v11  ;;  %v531_v19 = vpack.c.bf16 %v513_v15, %v511_v12  ;;  %v534_v20 = vpack.c.bf16 %v518_v17, %v516_v16  ;;  %v515_v21 = vld [vmem:[%s2873_s17 + $0x20] sm:$0xff]  ;;  %v517_v23 = vld [vmem:[%s2873_s17 + $0x30] sm:$0xff]  ;;  %vm1938_vm10 = vcmask 57344  }
  0x26   : > { %575 = vmatprep.subr.bf16.mxu0 %v558_v8  ;;  %593 = vmatprep.mubr.bf16.mxu0 %v532_v13  ;;  %v525_v22 = vmax.f32 %v515_v21, %v516_v16  ;;  %v528_v24 = vmax.f32 %v517_v23, %v518_v17  ;;  %v533_v25 = vpack.c.bf16 %v517_v23, %v515_v21  ;;  %vm1960_vm11 = vcmask 64512  }
  0x27   : > { %576 = vmatpush1.bf16.xpose.msra.mxu0 %v551_v9  ;;  %520 = vmax.xlane.f32.xlu0 %v519_v14  ;;  %v612_v14 = vld [vmem:[%s3192_s2 + $0x10] sm:$0xff] }
  0x2b   : > { %523 = vmax.xlane.f32.xlu0 %v522_v18 }
  0x2e   : > { %594 = vmatmul.mubr.bf16.vlgmr.msra.gmra.mxu0 %v531_v19 }
  0x2f   : > { %601 = vmatprep.mubr.bf16.mxu0 %v534_v20  ;;  %526 = vmax.xlane.f32.xlu0 %v525_v22 }
  0x33   : > { %529 = vmax.xlane.f32.xlu0 %v528_v24 }
  0x36   : > { %602 = vmatmul.mubr.bf16.gmra.mxu0 %v533_v25  ;;  %v613_v25 = vld [vmem:[%s3192_s2 + $0x18] sm:$0xff] }
  0xb0   : > { %v521_v31 = vpop.xlane.xlu0 %520 }
  0xb1   : > { %v639_v36 = vrot.slane %v521_v31, %v2886_v27  ;;  %v643_v37 = vrot.slane %v521_v31, %v2889_v28  ;;  %v647_v38 = vrot.slane %v521_v31, %v2892_v29  ;;  %v651_v39 = vrot.slane %v521_v31, %v2895_v30 }
  0xb2   : > { %v655_v40 = vrot.slane %v521_v31, %v2898_v32  ;;  %v659_v41 = vrot.slane %v521_v31, %v2901_v33  ;;  %v663_v42 = vrot.slane %v521_v31, %v2904_v34  ;;  %v667_v43 = vrot.slane %v521_v31, %v2907_v35 }
  0xb3   : > { %v764_v44 = vcombine.low %v639_v36, %v643_v37  ;;  %v765_v45 = vcombine.low %v647_v38, %v651_v39 }
  0xb4   : > { %v766_v46 = vcombine.low %v655_v40, %v659_v41  ;;  %v767_v47 = vcombine.low %v663_v42, %v667_v43  ;;  %v524_v59 = vpop.xlane.xlu0 %523 }
  0xb5   : > { %v774_v48 = vrot.slane %v764_v44, %v2865_v7  ;;  %v781_v49 = vrot.slane %v765_v45, %v2865_v7  ;;  %v671_v0 = vrot.slane %v524_v59, %v2886_v27  ;;  %v675_v3 = vrot.slane %v524_v59, %v2889_v28 }
  0xb6   : > { %v788_v50 = vrot.slane %v766_v46, %v2865_v7  ;;  %v795_v51 = vrot.slane %v767_v47, %v2865_v7  ;;  %v679_v5 = vrot.slane %v524_v59, %v2892_v29  ;;  %v683_v6 = vrot.slane %v524_v59, %v2895_v30 }
  0xb7   : > { %v796_v52 = vcombine.low %v774_v48, %v781_v49  ;;  %v687_v8 = vrot.slane %v524_v59, %v2898_v32  ;;  %v691_v10 = vrot.slane %v524_v59, %v2901_v33  ;;  %v695_v11 = vrot.slane %v524_v59, %v2904_v34 }
  0xb8   : > { %v797_v53 = vcombine.low %v788_v50, %v795_v51  ;;  %v699_v12 = vrot.slane %v524_v59, %v2907_v35  ;;  %v527_v15 = vpop.xlane.xlu0 %526  ;;  %v813_v18 = vcombine.low %v671_v0, %v675_v3  ;;  %v814_v19 = vcombine.low %v679_v5, %v683_v6 }
  0xb9   : > { %v804_v54 = vrot.slane %v796_v52, %v2865_v7  ;;  %v815_v21 = vcombine.low %v687_v8, %v691_v10  ;;  %v703_v23 = vrot.slane %v527_v15, %v2886_v27  ;;  %v707_v26 = vrot.slane %v527_v15, %v2889_v28 }
  0xba   : > { %v811_v55 = vrot.slane %v797_v53, %v2865_v7  ;;  %v816_v22 = vcombine.low %v695_v11, %v699_v12  ;;  %v711_v31 = vrot.slane %v527_v15, %v2892_v29  ;;  %v715_v36 = vrot.slane %v527_v15, %v2895_v30 }
  0xbb   : > { %v719_v37 = vrot.slane %v527_v15, %v2898_v32  ;;  %v723_v39 = vrot.slane %v527_v15, %v2901_v33  ;;  %v727_v40 = vrot.slane %v527_v15, %v2904_v34  ;;  %v731_v41 = vrot.slane %v527_v15, %v2907_v35 }
  0xbc   : > { %v812_v56 = vcombine.low %v804_v54, %v811_v55  ;;  %v530_v44 = vpop.xlane.xlu0 %529  ;;  %v823_v45 = vrot.slane %v813_v18, %v2865_v7  ;;  %v830_v47 = vrot.slane %v814_v19, %v2865_v7  ;;  %v837_v48 = vrot.slane %v815_v21, %v2865_v7 }
  0xbd   : > { %v844_v49 = vrot.slane %v816_v22, %v2865_v7  ;;  %v862_v50 = vcombine.low %v703_v23, %v707_v26  ;;  %v863_v52 = vcombine.low %v711_v31, %v715_v36  ;;  %v864_v53 = vcombine.low %v719_v37, %v723_v39 }
  0xbe   : > { %961 = vperm.xlu0 %2694, %v812_v56   ;;  %v865_v54 = vcombine.low %v727_v40, %v731_v41  ;;  %v735_v55 = vrot.slane %v530_v44, %v2886_v27  ;;  %v739_v56 = vrot.slane %v530_v44, %v2889_v28  ;;  %v751_v59 = vrot.slane %v530_v44, %v2898_v32 }
  0xbf   : > { %v846_v0 = vcombine.low %v837_v48, %v844_v49  ;;  %v879_v3 = vrot.slane %v863_v52, %v2865_v7  ;;  %v886_v5 = vrot.slane %v864_v53, %v2865_v7 }
  0xc0   : > { %v893_v6 = vrot.slane %v865_v54, %v2865_v7  ;;  %v911_v8 = vcombine.low %v735_v55, %v739_v56 }
  0xc2   : > { %v895_v15 = vcombine.low %v886_v5, %v893_v6 }
  0xc4   : > { %v909_v22 = vrot.slane %v895_v15, %v2865_v7 }
  0xee   : > { %v595_v58 = vpop.f32.mrf.mxu0 }
  0xef   : > { %v614_v60 = vmul.f32 %v610_v57, %v595_v58  ;;  %v743_v57 = vrot.slane %v530_v44, %v2892_v29  ;;  %v747_v58 = vrot.slane %v530_v44, %v2895_v30 }
  0xf0   : > { %v597_v61 = vpop.f32.mrf.mxu0 }
  0xf1   : > { %v619_v63 = vsel %vm618_vm0, %v614_v60, 0.0  ;;  %v755_v60 = vrot.slane %v530_v44, %v2901_v33  ;;  %v759_v61 = vrot.slane %v530_v44, %v2904_v34 }
  0xf2   : > { %620 = vadd.xlane.f32.xlu1 %v619_v63  ;;  %v598_v2 = vpop.f32.mrf.mxu0  ;;  %v845_v63 = vcombine.low %v823_v45, %v830_v47 }
  0xf3   : > { %v615_v9 = vmul.f32 %v611_v62, %v598_v2  ;;  %v763_v62 = vrot.slane %v530_v44, %v2907_v35  ;;  %v872_v2 = vrot.slane %v862_v50, %v2865_v7  ;;  %v913_v10 = vcombine.low %v751_v59, %v755_v60 }
  0xf4   : > { %v600_v13 = vpop.f32.mrf.mxu0  ;;  %v853_v12 = vrot.slane %v845_v63, %v2865_v7 }
  0xf5   : > { %v622_v16 = vsel %vm618_vm0, %v615_v9, 0.0  ;;  %v912_v9 = vcombine.low %v743_v57, %v747_v58  ;;  %v914_v11 = vcombine.low %v759_v61, %v763_v62  ;;  %v860_v13 = vrot.slane %v846_v0, %v2865_v7 }
  0xf6   : > { %623 = vadd.xlane.f32.xlu1 %v622_v16  ;;  %v603_v17 = vpop.f32.mrf.mxu0  ;;  %v921_v16 = vrot.slane %v911_v8, %v2865_v7  ;;  %v935_v18 = vrot.slane %v913_v10, %v2865_v7 }
  0xf7   : > { %v616_v20 = vmul.f32 %v612_v14, %v603_v17  ;;  %v894_v14 = vcombine.low %v872_v2, %v879_v3  ;;  %v928_v17 = vrot.slane %v912_v9, %v2865_v7  ;;  %v942_v19 = vrot.slane %v914_v11, %v2865_v7 }
  0xf8   : > { %v605_v24 = vpop.f32.mrf.mxu0 }
  0xf9   : > { %v625_v38 = vsel %vm618_vm0, %v616_v20, 0.0  ;;  %v861_v20 = vcombine.low %v853_v12, %v860_v13  ;;  %v902_v21 = vrot.slane %v894_v14, %v2865_v7  ;;  %v943_v23 = vcombine.low %v921_v16, %v928_v17 }
  0xfa   : > { %626 = vadd.xlane.f32.xlu1 %v625_v38  ;;  %v606_v42 = vpop.f32.mrf.mxu0  ;;  %v944_v24 = vcombine.low %v935_v18, %v942_v19 }
  0xfb   : > { %v617_v43 = vmul.f32 %v613_v25, %v606_v42  ;;  %v910_v25 = vcombine.low %v902_v21, %v909_v22  ;;  %v951_v26 = vrot.slane %v943_v23, %v2865_v7 }
  0xfc   : > { %v608_v46 = vpop.f32.mrf.mxu0  ;;  %v958_v31 = vrot.slane %v944_v24, %v2865_v7 }
  0xfd   : > { %v628_v51 = vsel %vm618_vm0, %v617_v43, 0.0 }
  0xfe   : > { %629 = vadd.xlane.f32.xlu1 %v628_v51  ;;  %v959_v36 = vcombine.low %v951_v26, %v958_v31 }
 0x10f   : > { %964 = vperm.xlu1 %2695, %v861_v20  }
 0x113   : > { %967 = vperm.xlu1 %2695, %v910_v25  }
 0x117   : > { %970 = vperm.xlu1 %2695, %v959_v36  }
 0x17b   : > { %v621_v37 = vpop.xlane.xlu1 %620 }
 0x17c   : > { %v1023_v38 = vrot.slane %v621_v37, %v2886_v27  ;;  %v1027_v39 = vrot.slane %v621_v37, %v2889_v28  ;;  %v1031_v40 = vrot.slane %v621_v37, %v2892_v29  ;;  %v1035_v41 = vrot.slane %v621_v37, %v2895_v30 }
 0x17d   : > { %v1039_v42 = vrot.slane %v621_v37, %v2898_v32  ;;  %v1043_v43 = vrot.slane %v621_v37, %v2901_v33  ;;  %v1047_v44 = vrot.slane %v621_v37, %v2904_v34  ;;  %v1051_v45 = vrot.slane %v621_v37, %v2907_v35 }
 0x17e   : > { %v1148_v46 = vcombine.low %v1023_v38, %v1027_v39  ;;  %v1149_v47 = vcombine.low %v1031_v40, %v1035_v41 }
 0x17f   : > { %v624_v48 = vpop.xlane.xlu1 %623  ;;  %v1150_v49 = vcombine.low %v1039_v42, %v1043_v43  ;;  %v1151_v50 = vcombine.low %v1047_v44, %v1051_v45 }
 0x180   : > { %v1158_v51 = vrot.slane %v1148_v46, %v2865_v7  ;;  %v1165_v52 = vrot.slane %v1149_v47, %v2865_v7  ;;  %v1055_v53 = vrot.slane %v624_v48, %v2886_v27  ;;  %v1059_v54 = vrot.slane %v624_v48, %v2889_v28 }
 0x181   : > { %v1172_v55 = vrot.slane %v1150_v49, %v2865_v7  ;;  %v1179_v56 = vrot.slane %v1151_v50, %v2865_v7  ;;  %v1063_v57 = vrot.slane %v624_v48, %v2892_v29  ;;  %v1067_v58 = vrot.slane %v624_v48, %v2895_v30 }
 0x182   : > { %v1180_v59 = vcombine.low %v1158_v51, %v1165_v52  ;;  %v1071_v60 = vrot.slane %v624_v48, %v2898_v32  ;;  %v1075_v61 = vrot.slane %v624_v48, %v2901_v33  ;;  %v1079_v62 = vrot.slane %v624_v48, %v2904_v34 }
 0x183   : > { %v627_v63 = vpop.xlane.xlu1 %626  ;;  %v1181_v0 = vcombine.low %v1172_v55, %v1179_v56  ;;  %v1083_v2 = vrot.slane %v624_v48, %v2907_v35  ;;  %v1197_v3 = vcombine.low %v1055_v53, %v1059_v54  ;;  %v1198_v5 = vcombine.low %v1063_v57, %v1067_v58 }
 0x184   : > { %v1188_v6 = vrot.slane %v1180_v59, %v2865_v7  ;;  %v1199_v8 = vcombine.low %v1071_v60, %v1075_v61  ;;  %v1087_v9 = vrot.slane %v627_v63, %v2886_v27  ;;  %v1091_v10 = vrot.slane %v627_v63, %v2889_v28 }
 0x185   : > { %v1195_v11 = vrot.slane %v1181_v0, %v2865_v7  ;;  %v1200_v12 = vcombine.low %v1079_v62, %v1083_v2  ;;  %v1207_v13 = vrot.slane %v1197_v3, %v2865_v7  ;;  %v1214_v14 = vrot.slane %v1198_v5, %v2865_v7 }
 0x186   : > { %v1221_v15 = vrot.slane %v1199_v8, %v2865_v7  ;;  %v1095_v16 = vrot.slane %v627_v63, %v2892_v29  ;;  %v1099_v17 = vrot.slane %v627_v63, %v2895_v30  ;;  %v1103_v18 = vrot.slane %v627_v63, %v2898_v32 }
 0x187   : > { %v630_v19 = vpop.xlane.xlu1 %629  ;;  %v1196_v20 = vcombine.low %v1188_v6, %v1195_v11  ;;  %v1228_v21 = vrot.slane %v1200_v12, %v2865_v7  ;;  %v1229_v22 = vcombine.low %v1207_v13, %v1214_v14  ;;  %v1107_v23 = vrot.slane %v627_v63, %v2901_v33  ;;  %v962_v12 = vpop.permute.xlu0 %961 }
 0x188   : > { %v1111_v24 = vrot.slane %v627_v63, %v2904_v34  ;;  %v1115_v25 = vrot.slane %v627_v63, %v2907_v35  ;;  %v1246_v26 = vcombine.low %v1087_v9, %v1091_v10  ;;  %v1247_v31 = vcombine.low %v1095_v16, %v1099_v17 }
 0x189   : > { %1345 = vperm.xlu1 %2695, %v1196_v20   ;;  %v1230_v36 = vcombine.low %v1221_v15, %v1228_v21  ;;  %v1237_v37 = vrot.slane %v1229_v22, %v2865_v7  ;;  %v1248_v38 = vcombine.low %v1103_v18, %v1107_v23  ;;  %v1119_v39 = vrot.slane %v630_v19, %v2886_v27 }
 0x18a   : > { %v1249_v40 = vcombine.low %v1111_v24, %v1115_v25  ;;  %v1256_v41 = vrot.slane %v1246_v26, %v2865_v7  ;;  %v1263_v42 = vrot.slane %v1247_v31, %v2865_v7  ;;  %v1123_v43 = vrot.slane %v630_v19, %v2889_v28 }
 0x18b   : > { %v1244_v44 = vrot.slane %v1230_v36, %v2865_v7  ;;  %v1270_v45 = vrot.slane %v1248_v38, %v2865_v7  ;;  %v1127_v46 = vrot.slane %v630_v19, %v2892_v29  ;;  %v1131_v47 = vrot.slane %v630_v19, %v2895_v30  ;;  %v965_v2 = vpop.permute.xlu1 %964 }
 0x18c   : > { %v1277_v48 = vrot.slane %v1249_v40, %v2865_v7  ;;  %v1278_v49 = vcombine.low %v1256_v41, %v1263_v42  ;;  %v1135_v50 = vrot.slane %v630_v19, %v2898_v32  ;;  %v1139_v51 = vrot.slane %v630_v19, %v2901_v33 }
 0x18d   : > { %v1245_v52 = vcombine.low %v1237_v37, %v1244_v44  ;;  %v1143_v53 = vrot.slane %v630_v19, %v2904_v34  ;;  %v1147_v28 = vrot.slane %v630_v19, %v2907_v35  ;;  %v1295_v54 = vcombine.low %v1119_v39, %v1123_v43  ;;  %v631_v43 = vld [vmem:[%s3193_s3] sm:$0x1] }
 0x18e   : > { %v1279_v55 = vcombine.low %v1270_v45, %v1277_v48  ;;  %v1286_v56 = vrot.slane %v1278_v49, %v2865_v7  ;;  %v1296_v57 = vcombine.low %v1127_v46, %v1131_v47  ;;  %v1297_v29 = vcombine.low %v1135_v50, %v1139_v51  ;;  %v1015_v44 = vld [vmem:[%s3194_s4] sm:$0x1] }
 0x18f   : > { %1348 = vperm.xlu1 %2695, %v1245_v52   ;;  %v1298_v30 = vcombine.low %v1143_v53, %v1147_v28  ;;  %v1305_v58 = vrot.slane %v1295_v54, %v2865_v7  ;;  %v968_v3 = vpop.permute.xlu1 %967  ;;  %v3038_v5 = vand.u32 127, %v548_v1  ;;  %v1415_v53 = vstv %s2524_s23 }
 0x190   : > { %v1293_v59 = vrot.slane %v1279_v55, %v2865_v7  ;;  %v1312_v32 = vrot.slane %v1296_v57, %v2865_v7  ;;  %v1319_v33 = vrot.slane %v1297_v29, %v2865_v7  ;;  %v1418_v55 = vstv %s2525_s24 }
 0x191   : > { %v1326_v34 = vrot.slane %v1298_v30, %v2865_v7  ;;  %v978_v6 = vadd.s32 4294967288, %v3038_v5  ;;  %v985_v9 = vadd.s32 4294967280, %v3038_v5  ;;  %v976_v11 = vsub.s32 %v3038_v5, %v2859_v4 }
 0x192   : > { %v1294_v60 = vcombine.low %v1286_v56, %v1293_v59  ;;  %v1327_v35 = vcombine.low %v1305_v58, %v1312_v32  ;;  %v992_v14 = vadd.s32 4294967272, %v3038_v5  ;;  %vm1408_vm5 = vcmp.lt.s32.totalorder %v3038_v5, 31 }
 0x193   : > { %v1328_v61 = vcombine.low %v1319_v33, %v1326_v34  ;;  %v971_v8 = vpop.permute.xlu1 %970  ;;  %v981_v10 = vsub.s32 %v978_v6, %v2859_v4  ;;  %v988_v15 = vsub.s32 %v985_v9, %v2859_v4  ;;  %v977_v17 = vrot.slane %v962_v12, %v976_v11  ;;  %v1446_v6 = vld [vmem:[%s3197_s7 + $0x10] sm:$0xff]  ;;  %v1444_v9 = vld [vmem:[%s3197_s7] sm:$0xff] }
 0x194   : > { %1351 = vperm.xlu1 %2695, %v1294_v60   ;;  %v1335_v62 = vrot.slane %v1327_v35, %v2865_v7  ;;  %v995_v1 = vsub.s32 %v992_v14, %v2859_v4  ;;  %vm1395_vm6 = vcmp.gt.s32.totalorder %v3038_v5, 0  ;;  %v1422_v32 = vstv %s1421_s25 }
 0x195   : > { %v1342_v63 = vrot.slane %v1328_v61, %v2865_v7  ;;  %v982_v16 = vrot.slane %v965_v2, %v981_v10  ;;  %v989_v18 = vrot.slane %v968_v3, %v988_v15  ;;  %v1447_v3 = vld [vmem:[%s3197_s7 + $0x18] sm:$0xff]  ;;  %v3078_v12 = vand.u32 4294901760, %v1446_v6 }
 0x196   : > { %v996_v21 = vrot.slane %v971_v8, %v995_v1  ;;  %v3065_v5 = vand.u32 4294901760, %v1447_v3  ;;  %v1445_v8 = vld [vmem:[%s3197_s7 + $0x8] sm:$0xff]  ;;  %v3083_v14 = vand.u32 4294901760, %v1444_v9 }
 0x197   : > { %v1343_v0 = vcombine.low %v1335_v62, %v1342_v63  ;;  %v984_v20 = vsel %vm983_vm1, %v982_v16, %v977_v17 }
 0x198   : > { %v991_v22 = vsel %vm990_vm2, %v989_v18, %v984_v20  ;;  %v1579_v17 = vsub.f32 %v1444_v9, %v3083_v14 }
 0x199   : > { %1354 = vperm.xlu1 %2695, %v1343_v0   ;;  %v998_v24 = vsel %vm997_vm3, %v996_v21, %v991_v22  ;;  %v1440_v21 = vld [vmem:[%s3195_s5] sm:$0x1] }
 0x19a   : > { %v1005_v36 = vrot.slane %v998_v24, %v2865_v7 }
 0x19c   : > { %v1012_v41 = vrot.slane %v1005_v36, %v2865_v7 }
 0x19e   : > { %v1014_v46 = vmul.f32 %v1012_v41, %v631_v43 }
 0x204   : > { %v1346_v13 = vpop.permute.xlu1 %1345 }
 0x205   : > { %v1359_v31 = vrot.slane %v1346_v13, %v976_v11  ;;  %v1558_v11 = vsub.f32 %v1447_v3, %v3065_v5  ;;  %v3080_v13 = vand.u32 4294901760, %v1445_v8 }
 0x207   : > { %v1572_v16 = vsub.f32 %v1445_v8, %v3080_v13  ;;  %v1559_v36 = vand.u32 4294901760, %v1558_v11 }
 0x20a   : > { %v1349_v19 = vpop.permute.xlu1 %1348 }
 0x20b   : > { %v1363_v25 = vrot.slane %v1349_v19, %v981_v10  ;;  %v2741_v10 = vmov 0.0  }
 0x20c   : > { %2594 = vmatprep.subr.mxu0 %v2741_v10  ;;  %2572 = vmatprep.subr.mxu1 %v2741_v10 }
 0x20d   : > { %v1364_v38 = vsel %vm983_vm1, %v1363_v25, %v1359_v31  ;;  %2573 = vmatpush3.msra.mxu1 %v3065_v5  ;;  %2602 = vmatprep.mubr.msk.f32.mxu0 %vm2742_vm8, %v2741_v10 }
 0x20e   : > { %2595 = vmatpush3.msra.mxu0 %v1558_v11  ;;  %2574 = vmatprep.subr.mxu1 %v2741_v10 }
 0x20f   : > { %v1352_v23 = vpop.permute.xlu1 %1351  ;;  %2596 = vmatprep.subr.mxu0 %v2741_v10  ;;  %2575 = vmatpush3.msra.mxu1 %v3078_v12 }
 0x210   : > { %v1368_v26 = vrot.slane %v1352_v23, %v988_v15  ;;  %v1565_v15 = vsub.f32 %v1446_v6, %v3078_v12  ;;  %2576 = vmatprep.subr.mxu1 %v2741_v10  ;;  %2580 = vmatprep.mubr.msk.f32.mxu1 %vm2742_vm8, %v2741_v10  ;;  %v1442_v23 = vld [vmem:[%s3196_s6] sm:$0x1] }
 0x211   : > { %2577 = vmatpush3.msra.mxu1 %v3080_v13  ;;  %v1958_v6 = vld [vmem:[%s3201_s11] sm:$0xff] }
 0x212   : > { %v1369_v4 = vsel %vm990_vm2, %v1368_v26, %v1364_v38  ;;  %2597 = vmatpush3.msra.mxu0 %v1565_v15  ;;  %2578 = vmatprep.subr.mxu1 %v2741_v10  ;;  %v1566_v38 = vand.u32 4294901760, %v1565_v15  ;;  %v1995_v8 = vand.u32 4294901760, %v1958_v6 }
 0x213   : > { %2598 = vmatprep.subr.mxu0 %v2741_v10  ;;  %2579 = vmatpush3.msra.mxu1 %v3083_v14 }
 0x214   : > { %v1355_v37 = vpop.permute.xlu1 %1354  ;;  %2599 = vmatpush3.msra.mxu0 %v1572_v16  ;;  %2583 = vmatprep.subr.mxu1 %v2741_v10  ;;  %v1567_v41 = vsub.f32 %v1565_v15, %v1566_v38  ;;  %v2072_v9 = vsub.f32 %v1958_v6, %v1995_v8 }
 0x215   : > { %v1373_v39 = vrot.slane %v1355_v37, %v995_v1  ;;  %2600 = vmatprep.subr.mxu0 %v2741_v10 }
 0x216   : > { %2601 = vmatpush3.msra.mxu0 %v1579_v17 }
 0x217   : > { %v1374_v40 = vsel %vm997_vm3, %v1373_v39, %v1369_v4  ;;  %2616 = vmatprep.subr.mxu0 %v2741_v10  ;;  %v1560_v39 = vsub.f32 %v1558_v11, %v1559_v36  ;;  %v2073_v11 = vand.u32 4294901760, %v2072_v9 }
 0x218   : > { %v1381_v42 = vrot.slane %v1374_v40, %v2865_v7  ;;  %v1573_v40 = vand.u32 4294901760, %v1572_v16 }
 0x219   : > { %v1561_v43 = vand.u32 4294901760, %v1560_v39 }
 0x21a   : > { %v1388_v45 = vrot.slane %v1381_v42, %v2865_v7  ;;  %v1413_v7 = vstv %s1392_s14 }
 0x21c   : > { %v1390_v47 = vmul.f32 %v1388_v45, %v1015_v44  ;;  %v1580_v44 = vand.u32 4294901760, %v1579_v17  ;;  %v1574_v45 = vsub.f32 %v1572_v16, %v1573_v40 }
 0x21e   : > { %v1391_v48 = vadd.f32 %v1390_v47, %v1014_v46  ;;  %v1568_v47 = vand.u32 4294901760, %v1567_v41 }
 0x220   : > { %1397 = vrot.lane.b32.xlu1 %v1391_v48, %s2738_s18  ;;  %v1416_v30 = vmul.f32 %v1415_v53, %v1391_v48 }
 0x292   : > { %v1398_v49 = vpop.permute.xlu1 %1397 }
 0x293   : > { %v1399_v50 = vsel %vm1396_vm4, %v1398_v49, %v1391_v48  ;;  %v1575_v49 = vand.u32 4294901760, %v1574_v45 }
 0x294   : > { %1400 = vrot.lane.b32.xlu0 %v1399_v50, %s2738_s18 }
 0x306   : > { %v1401_v51 = vpop.permute.xlu0 %1400 }
 0x307   : > { %v1402_v52 = vsel %vm1396_vm4, %v1401_v51, %v1391_v48 }
 0x308   : > { %1409 = vrot.lane.b32.xlu0 %v1402_v52, %s2739_s19  ;;  %1404 = vrot.lane.b32.xlu1 %v1402_v52, %s2740_s22 }
 0x37a   : > { %v1410_v28 = vpop.permute.xlu0 %1409  ;;  %v1405_v54 = vpop.permute.xlu1 %1404 }
 0x37b   : > { %v1412_v56 = vsel %vm1408_vm5, %v1410_v28, 0.0  ;;  %v1407_v57 = vsel %vm1395_vm6, %v1405_v54, 0.0 }
 0x37c   : > { %v1414_v29 = vmul.f32 %v1413_v7, %v1407_v57  ;;  %v1419_v58 = vmul.f32 %v1418_v55, %v1412_v56  ;;  %v1448_v55 = vld [vmem:[%s3198_s8] sm:$0x1] }
 0x37e   : > { %v1417_v59 = vadd.f32 %v1416_v30, %v1414_v29 }
 0x380   : > { %v1420_v33 = vadd.f32 %v1419_v58, %v1417_v59 }
 0x382   : > { %v1423_v34 = vadd.f32 %v1422_v32, %v1420_v33 }
 0x384   : > { %v1424_v60 = vadd.f32 %v1423_v34, %v1391_v48  ;;  %v1581_v48 = vsub.f32 %v1579_v17, %v1580_v44 }
 0x386   : > { %v1426_v35 = vsel %vm1425_vm7, %v1424_v60, 0.0  ;;  %v1582_v50 = vand.u32 4294901760, %v1581_v48 }
 0x387   : > { %1427 = vadd.xlane.f32.xlu1 %v1426_v35 }
 0x410   : > { %v1428_v61 = vpop.xlane.xlu1 %1427 }
 0x411   : > { %v1430_v62 = vmul.f32 0.03125, %v1428_v61 }
 0x413   : > { %v1431_v63 = vsub.f32 %v1424_v60, %v1430_v62 }
 0x415   : > { %v1432_v0 = vmul.f32 %v1431_v63, %v1431_v63 }
 0x417   : > { %v1433_v2 = vsel %vm1425_vm7, %v1432_v0, 0.0 }
 0x418   : > { %1434 = vadd.xlane.f32.xlu0 %v1433_v2 }
 0x4a1   : > { %v1435_v1 = vpop.xlane.xlu0 %1434 }
 0x4a2   : > { %v1436_v18 = vmul.f32 0.03125, %v1435_v1  ;;  %v1953_v1 = vld [vmem:[%s3199_s9] sm:$0x1] }
 0x4a4   : > { %v1437_v19 = vadd.f32 1e-05, %v1436_v18 }
 0x4a6   : > { %2696 = vrsqrt.f32 %v1437_v19  ;;  %v1955_v19 = vld [vmem:[%s3200_s10] sm:$0x1] }
 0x4b3   : > { %v2697_v20 = vpop.eup %2696 }
 0x4b4   : > { %v1439_v22 = vmul.f32 %v2697_v20, %v1431_v63 }
 0x4b6   : > { %v1441_v24 = vmul.f32 %v1440_v21, %v1439_v22 }
 0x4b8   : > { %v1443_v25 = vadd.f32 %v1442_v23, %v1441_v24 }
 0x4ba   : > { %v1451_v26 = vsel %vm1449_vm9, %v1443_v25, 0 }
 0x4bb   : > { %v1522_v31 = vand.u32 4294901760, %v1451_v26 }
 0x4bd   : > { %v1523_v37 = vsub.f32 %v1451_v26, %v1522_v31 }
 0x4bf   : > { %2603 = vmatmul.mubr.f32.vlgmr.msra.gmra.mxu0 %v1523_v37  ;;  %v1524_v4 = vand.u32 4294901760, %v1523_v37 }
 0x4c0   : > { %2617 = vmatpush3.msra.mxu0 %v1559_v36  ;;  %2624 = vmatprep.mubr.msk.f32.mxu0 %vm2742_vm8, %v2741_v10 }
 0x4c1   : > { %2618 = vmatprep.subr.mxu0 %v2741_v10  ;;  %v1525_v42 = vsub.f32 %v1523_v37, %v1524_v4 }
 0x4c2   : > { %2619 = vmatpush3.msra.mxu0 %v1566_v38 }
 0x4c3   : > { %2620 = vmatprep.subr.mxu0 %v2741_v10  ;;  %v1526_v46 = vand.u32 4294901760, %v1525_v42 }
 0x4c4   : > { %2621 = vmatpush3.msra.mxu0 %v1573_v40  ;;  %v1959_v40 = vld [vmem:[%s3202_s12] sm:$0x1] }
 0x4c5   : > { %2622 = vmatprep.subr.mxu0 %v2741_v10  ;;  %2581 = vmatmul.mubr.f32.vlgmr.msra.gmra.mxu1 %v1526_v46 }
 0x4c6   : > { %2584 = vmatpush3.msra.mxu1 %v1561_v43  ;;  %2623 = vmatpush3.msra.mxu0 %v1580_v44 }
 0x4c7   : > { %2585 = vmatprep.subr.mxu1 %v2741_v10  ;;  %2625 = vmatmul.mubr.f32.vlgmr.msra.gmra.mxu0 %v1522_v31 }
 0x4c8   : > { %2586 = vmatpush3.msra.mxu1 %v1568_v47  ;;  %2591 = vmatprep.mubr.msk.f32.mxu1 %vm2742_vm8, %v2741_v10 }
 0x4c9   : > { %2587 = vmatprep.subr.mxu1 %v2741_v10  ;;  %2638 = vmatprep.subr.mxu0 %v2741_v10 }
 0x4ca   : > { %2588 = vmatpush3.msra.mxu1 %v1575_v49  ;;  %2640 = vmatprep.mubr.msk.f32.mxu0 %vm2742_vm8, %v2741_v10 }
 0x4cb   : > { %2589 = vmatprep.subr.mxu1 %v2741_v10  ;;  %2639 = vmatpush3.msra.mxu0 %v1995_v8 }
 0x4cc   : > { %2590 = vmatpush3.msra.mxu1 %v1582_v50  ;;  %2648 = vmatprep.subr.mxu0 %v2741_v10 }
 0x4cd   : > { %2592 = vmatmul.mubr.f32.vlgmr.msra.gmra.mxu1 %v1522_v31  ;;  %2605 = vmatprep.subr.mxu1 %v2741_v10 }
 0x4ce   : > { %2606 = vmatpush3.msra.mxu1 %v3065_v5  ;;  %2613 = vmatprep.mubr.msk.f32.mxu1 %vm2742_vm8, %v2741_v10 }
 0x4cf   : > { %2607 = vmatprep.subr.mxu1 %v2741_v10 }
 0x4d0   : > { %2608 = vmatpush3.msra.mxu1 %v3078_v12 }
 0x4d1   : > { %2609 = vmatprep.subr.mxu1 %v2741_v10 }
 0x4d2   : > { %2610 = vmatpush3.msra.mxu1 %v3080_v13 }
 0x4d3   : > { %2611 = vmatprep.subr.mxu1 %v2741_v10 }
 0x4d4   : > { %2612 = vmatpush3.msra.mxu1 %v3083_v14 }
 0x4d5   : > { %2614 = vmatmul.mubr.f32.vlgmr.msra.gmra.mxu1 %v1524_v4  ;;  %2627 = vmatprep.subr.mxu1 %v2741_v10 }
 0x4d6   : > { %2628 = vmatpush3.msra.mxu1 %v3065_v5  ;;  %2635 = vmatprep.mubr.msk.f32.mxu1 %vm2742_vm8, %v2741_v10 }
 0x4d7   : > { %2629 = vmatprep.subr.mxu1 %v2741_v10 }
 0x4d8   : > { %2630 = vmatpush3.msra.mxu1 %v3078_v12  ;;  %v2074_v12 = vsub.f32 %v2072_v9, %v2073_v11 }
 0x4d9   : > { %2631 = vmatprep.subr.mxu1 %v2741_v10 }
 0x4da   : > { %2632 = vmatpush3.msra.mxu1 %v3080_v13  ;;  %v2075_v13 = vand.u32 4294901760, %v2074_v12 }
 0x4db   : > { %2633 = vmatprep.subr.mxu1 %v2741_v10 }
 0x4dc   : > { %2634 = vmatpush3.msra.mxu1 %v3083_v14 }
 0x4dd   : > { %2636 = vmatmul.mubr.f32.vlgmr.msra.gmra.mxu1 %v1522_v31  ;;  %2643 = vmatprep.subr.mxu1 %v2741_v10 }
 0x4de   : > { %2645 = vmatprep.mubr.msk.f32.mxu1 %vm2742_vm8, %v2741_v10  ;;  %2644 = vmatpush3.msra.mxu1 %v2075_v13 }
 0x4df   : > { %2653 = vmatprep.subr.mxu1 %v2741_v10 }
 0x57f   : > { %v1699_v51 = vpop.f32.mrf.mxu0 }
 0x581   : > { %v2604_v52 = vpop.f32.mrf.mxu0 }
 0x585   : > { %v1528_v7 = vpop.f32.mrf.mxu1 }
 0x586   : > { %v1529_v29 = vadd.f32 %v1528_v7, %v1448_v55  ;;  %v2700_v55 = vld [vmem:[%s2873_s17 + $0x10] sm:$0xff] }
 0x587   : > { %v1859_v53 = vpop.f32.mrf.mxu0  ;;  %v2582_v28 = vpop.f32.mrf.mxu1 }
 0x589   : > { %v2626_v54 = vpop.f32.mrf.mxu0 }
 0x58d   : > { %v1619_v56 = vpop.f32.mrf.mxu1 }
 0x58e   : > { %v1620_v30 = vadd.f32 %v1619_v56, %v1529_v29 }
 0x58f   : > { %v2593_v57 = vpop.f32.mrf.mxu1 }
 0x590   : > { %v1700_v59 = vadd.f32 %v1699_v51, %v1620_v30  ;;  %v2701_v57 = vld [vmem:[%s2873_s17 + $0x18] sm:$0xff]  ;;  %v2702_v30 = vld [vmem:[%s2873_s17] sm:$0xff] }
 0x595   : > { %v1776_v58 = vpop.f32.mrf.mxu1 }
 0x596   : > { %v1777_v33 = vadd.f32 %v1776_v58, %v1700_v59  ;;  %v2703_v58 = vld [vmem:[%s2873_s17 + $0x8] sm:$0xff] }
 0x597   : > { %v2615_v32 = vpop.f32.mrf.mxu1 }
 0x598   : > { %v1860_v34 = vadd.f32 %v1859_v53, %v1777_v33 }
 0x59d   : > { %v1934_v60 = vpop.f32.mrf.mxu1 }
 0x59e   : > { %v1935_v35 = vadd.f32 %v1934_v60, %v1860_v34  ;;  %v2704_v34 = vld [vmem:[%s2873_s17 + $0x20] sm:$0xff] }
 0x59f   : > { %v2637_v61 = vpop.f32.mrf.mxu1 }
 0x5a0   : > { %v1939_v62 = vsel %vm1938_vm10, %v1935_v35, 0.0 }
 0x5a1   : > { %1940 = vadd.xlane.f32.xlu0 %v1939_v62  ;;  %v2706_v62 = vld [vmem:[%s2873_s17 + $0x30] sm:$0xff] }
 0x62a   : > { %v1941_v63 = vpop.xlane.xlu0 %1940 }
 0x62b   : > { %v1943_v0 = vmul.f32 0.125, %v1941_v63 }
 0x62d   : > { %v1944_v2 = vsub.f32 %v1935_v35, %v1943_v0  ;;  %v2705_v35 = vld [vmem:[%s2873_s17 + $0x28] sm:$0xff]  ;;  %v2707_v0 = vld [vmem:[%s2873_s17 + $0x38] sm:$0xff] }
 0x62f   : > { %v1945_v3 = vmul.f32 %v1944_v2, %v1944_v2 }
 0x631   : > { %v1946_v5 = vsel %vm1938_vm10, %v1945_v3, 0.0 }
 0x632   : > { %1947 = vadd.xlane.f32.xlu1 %v1946_v5 }
 0x6bb   : > { %v1948_v14 = vpop.xlane.xlu1 %1947 }
 0x6bc   : > { %v1949_v15 = vmul.f32 0.125, %v1948_v14 }
 0x6be   : > { %v1950_v16 = vadd.f32 1e-05, %v1949_v15 }
 0x6c0   : > { %2698 = vrsqrt.f32 %v1950_v16 }
 0x6cd   : > { %v2699_v17 = vpop.eup %2698 }
 0x6ce   : > { %v1952_v18 = vmul.f32 %v2699_v17, %v1944_v2 }
 0x6d0   : > { %v1954_v20 = vmul.f32 %v1953_v1, %v1952_v18 }
 0x6d2   : > { %v1956_v21 = vadd.f32 %v1955_v19, %v1954_v20 }
 0x6d4   : > { %v1957_v22 = vmax.f32 %v1956_v21, 0.0 }
 0x6d6   : > { %v1962_v23 = vsel %vm1960_vm11, %v1957_v22, 0 }
 0x6d7   : > { %v2030_v24 = vand.u32 4294901760, %v1962_v23 }
 0x6d9   : > { %v2031_v25 = vsub.f32 %v1962_v23, %v2030_v24  ;;  %2646 = vmatmul.mubr.f32.vlgmr.msra.gmra.mxu1 %v2030_v24 }
 0x6da   : > { %2654 = vmatpush3.msra.mxu1 %v1995_v8  ;;  %2655 = vmatprep.mubr.msk.f32.mxu1 %vm2742_vm8, %v2741_v10 }
 0x6db   : > { %v2032_v26 = vand.u32 4294901760, %v2031_v25  ;;  %2663 = vmatprep.subr.mxu1 %v2741_v10 }
 0x6dd   : > { %2656 = vmatmul.mubr.f32.vlgmr.msra.gmra.mxu1 %v2032_v26  ;;  %v2033_v31 = vsub.f32 %v2031_v25, %v2032_v26 }
 0x6de   : > { %2664 = vmatpush3.msra.mxu1 %v1995_v8  ;;  %2665 = vmatprep.mubr.msk.f32.mxu1 %vm2742_vm8, %v2741_v10 }
 0x6df   : > { %v2034_v36 = vand.u32 4294901760, %v2033_v31 }
 0x6e1   : > { %2641 = vmatmul.mubr.f32.vlgmr.msra.gmra.mxu0 %v2034_v36  ;;  %2666 = vmatmul.mubr.f32.vlgmr.msra.gmra.mxu1 %v2030_v24 }
 0x6e2   : > { %2649 = vmatpush3.msra.mxu0 %v2072_v9  ;;  %2650 = vmatprep.mubr.msk.f32.mxu0 %vm2742_vm8, %v2741_v10 }
 0x6e3   : > { %2658 = vmatprep.subr.mxu0 %v2741_v10 }
 0x6e5   : > { %2651 = vmatmul.mubr.f32.vlgmr.msra.gmra.mxu0 %v2031_v25 }
 0x6e6   : > { %2659 = vmatpush3.msra.mxu0 %v2073_v11  ;;  %2660 = vmatprep.mubr.msk.f32.mxu0 %vm2742_vm8, %v2741_v10 }
 0x6e9   : > { %2661 = vmatmul.mubr.f32.vlgmr.msra.gmra.mxu0 %v2030_v24 }
 0x799   : > { %v2112_v37 = vpop.f32.mrf.mxu1 }
 0x79b   : > { %v2647_v38 = vpop.f32.mrf.mxu1 }
 0x79d   : > { %v2260_v39 = vpop.f32.mrf.mxu1 }
 0x79f   : > { %v2657_v4 = vpop.f32.mrf.mxu1 }
 0x7a1   : > { %v2036_v41 = vpop.f32.mrf.mxu0  ;;  %v2406_v42 = vpop.f32.mrf.mxu1 }
 0x7a2   : > { %v2037_v43 = vadd.f32 %v2036_v41, %v1959_v40 }
 0x7a3   : > { %v2642_v44 = vpop.f32.mrf.mxu0  ;;  %v2667_v45 = vpop.f32.mrf.mxu1 }
 0x7a4   : > { %v2113_v46 = vadd.f32 %v2112_v37, %v2037_v43 }
 0x7a5   : > { %v2186_v47 = vpop.f32.mrf.mxu0 }
 0x7a6   : > { %v2187_v48 = vadd.f32 %v2186_v47, %v2113_v46 }
 0x7a7   : > { %v2652_v10 = vpop.f32.mrf.mxu0 }
 0x7a8   : > { %v2261_v49 = vadd.f32 %v2260_v39, %v2187_v48 }
 0x7a9   : > { %v2334_v50 = vpop.f32.mrf.mxu0 }
 0x7aa   : > { %v2335_v51 = vadd.f32 %v2334_v50, %v2261_v49 }
 0x7ab   : > { %v2662_v52 = vpop.f32.mrf.mxu0 }
 0x7ac   : > { %v2407_v7 = vadd.f32 %v2406_v42, %v2335_v51 }
 0x7ae   : > { %v2413_v53 = vrot.slane %v2407_v7, %v2886_v27 }
 0x7b0   : > { %2419 = vbcast.lane.b32.xlu1 %v2413_v53, 264  ;;  %2415 = vbcast.lane.b32.xlu0 %v2413_v53, 256 }
 0x7b4   : > { %2423 = vbcast.lane.b32.xlu1 %v2413_v53, 272  ;;  %2427 = vbcast.lane.b32.xlu0 %v2413_v53, 280 }
 0x822   : > { %v2420_v28 = vpop.permute.xlu1 %2419  ;;  %v2416_v54 = vpop.permute.xlu0 %2415 }
 0x823   : > { %v2431_v56 = vadd.f32 %v2700_v55, %v2420_v28  ;;  %v2432_v29 = vadd.f32 %v2701_v57, %v2420_v28  ;;  %v2429_v27 = vadd.f32 %v2702_v30, %v2416_v54  ;;  %v2430_v59 = vadd.f32 %v2703_v58, %v2416_v54 }
 0x825   : > { %2439 = vst [vmem:[%s509_s26 + $0x10] sm:$0xff] %v2431_v56  ;;  %2440 = vst [vmem:[%s509_s26 + $0x18] sm:$0xff] %v2432_v29 }
 0x826   : > { %2437 = vst [vmem:[%s509_s26] sm:$0xff] %v2429_v27  ;;  %2438 = vst [vmem:[%s509_s26 + $0x8] sm:$0xff] %v2430_v59  ;;  %v2424_v32 = vpop.permute.xlu1 %2423  ;;  %v2428_v33 = vpop.permute.xlu0 %2427 }
 0x827   : > { %v2433_v60 = vadd.f32 %v2704_v34, %v2424_v32  ;;  %v2434_v61 = vadd.f32 %v2705_v35, %v2424_v32  ;;  %v2435_v63 = vadd.f32 %v2706_v62, %v2428_v33  ;;  %v2436_v2 = vadd.f32 %v2707_v0, %v2428_v33 }
 0x829   : > { %2441 = vst [vmem:[%s509_s26 + $0x20] sm:$0xff] %v2433_v60  ;;  %2442 = vst [vmem:[%s509_s26 + $0x28] sm:$0xff] %v2434_v61 }
 0x82a   : > { %2443 = vst [vmem:[%s509_s26 + $0x30] sm:$0xff] %v2435_v63  ;;  %2444 = vst [vmem:[%s509_s26 + $0x38] sm:$0xff] %v2436_v2 }
 0x82b PF: > { %s27_s20 = sadd.s32 1, %s2733_s20  }
 0x82c   : > { %p24_p1 = scmp.ge.s32.totalorder %s27_s20, 4  }
 0x82e   :  { %26 = sbr.rel (!%p24_p1) target bundleno = 3 (0x3), region = 115 }
 0x833   :  { %2466 = vsyncpa [#allocation4], 1 }
 0x834   :  { %2468 = vsyncpa [#allocation4 + $0x1], 1 }

</bundles_post_ra>
